<compile_context>
chip_gen: v7x
topology: tpu7x:2x2x1
jax: 0.10.0
libtpu: 0.0.40
codegen_flags: <defaults>
</compile_context>

<pallas_src>
import jax
import jax.numpy as jnp
from jax.experimental import pallas as pl
from jax.experimental.pallas import tpu as pltpu


def ensemble_kernel(x_ref, w_ref, b_ref, o_ref):
    """One lane-dense class tile of sum_m (x @ W_m) + sum_m b_m.

    x_ref: (B, H)         w_ref: (M, H, TC)   (W_m^T stacked over models)
    b_ref: (1, TC)        o_ref: (B, TC)      (bias pre-summed over models)
    """
    num_models = w_ref.shape[0]
    x = x_ref[...]
    # f32 accumulator seeded with the pre-summed bias (broadcast hoisted out of
    # the model loop).  Per-model matmuls accumulate on the MXU in f32 — no
    # materialized w_sum, no extra VALU / vector-store pressure.
    acc = jnp.broadcast_to(b_ref[...], o_ref.shape).astype(jnp.float32)
    for m in range(num_models):
        acc = acc + jnp.dot(x, w_ref[m], preferred_element_type=jnp.float32)
    o_ref[...] = acc.astype(o_ref.dtype)


def _pick_c_block(M, H, C, itemsize, weight_block_budget=8 << 20):
    """Largest lane-dense class tile whose double-buffered weight slab fits budget."""
    per_class_bytes = 2 * M * H * itemsize          # x2: Pallas double-buffers inputs
    max_cb = max(128, (weight_block_budget // per_class_bytes) // 128 * 128)
    if C <= max_cb:
        # Whole-C fits comfortably; still split in two when possible so both of
        # v7x's TensorCores get work on the "parallel" class axis.
        if C >= 256 and C % 256 == 0:
            return C // 2
        return C
    cb = min(max_cb, (C // 128) * 128)
    while cb >= 128:
        if C % cb == 0:
            return cb
        cb -= 128
    # TODO(synk): pad/mask a ragged last class tile when C is not a multiple of
    # 128 and the whole-C slab exceeds the VMEM budget; fall back to whole C.
    return C


def ensemble_forward(x, weights, biases, *, presum_weights=False,
                     compute_dtype=None, c_block=None):
    """
    x:       (B, H)
    weights: (M, H, C)  — W_m^T stacked over models (nn.Linear weight, transposed)
    biases:  (M, C)
    returns: (B, C) = sum_m (x @ weights[m] + biases[m])
    """
    B, H = x.shape
    M, Hw, C = weights.shape
    assert H == Hw and biases.shape == (M, C)
    out_dtype = x.dtype

    # Bias sum commutes with the ensemble sum: one (1, C) f32 row instead of M
    # sublane-padded rows.
    b_sum = jnp.sum(biases.astype(jnp.float32), axis=0, keepdims=True)

    if presum_weights:
        # Static-weight (inference) fast path: fold the model sum into the
        # weights outside the kernel, in f32 (do NOT sum in bf16).  Cuts HBM
        # weight traffic and VMEM footprint by ~M x; cache this slab across
        # calls when the checkpoints are static.
        weights = jnp.sum(weights.astype(jnp.float32), axis=0, keepdims=True)
        M_eff = 1
    else:
        M_eff = M

    if compute_dtype is not None:
        weights = weights.astype(compute_dtype)
        x = x.astype(compute_dtype)

    itemsize = jnp.dtype(weights.dtype).itemsize
    if c_block is None:
        c_block = _pick_c_block(M_eff, H, C, itemsize)
    assert C % c_block == 0
    assert c_block == C or c_block % 128 == 0
    n_c = C // c_block

    # Scoped-VMEM budget: double-buffered weight/output blocks + x + padded
    # bias row + headroom; clamped so it stays inside v7x's 64 MiB physical VMEM.
    vmem_est = (
        2 * M_eff * H * c_block * itemsize                     # weight blocks
        + 2 * B * H * itemsize                                 # x block
        + 2 * 8 * c_block * 4                                  # bias row (padded to 8 sublanes)
        + 2 * B * c_block * jnp.dtype(out_dtype).itemsize      # output blocks
    )
    vmem_limit = int(min(max(vmem_est * 5 // 4 + (4 << 20), 16 << 20), 48 << 20))

    return pl.pallas_call(
        ensemble_kernel,
        out_shape=jax.ShapeDtypeStruct((B, C), out_dtype),
        grid_spec=pltpu.PrefetchScalarGridSpec(
            num_scalar_prefetch=0,
            grid=(n_c,),
            in_specs=[
                pl.BlockSpec((B, H), lambda j: (0, 0)),               # x reused
                pl.BlockSpec((M_eff, H, c_block), lambda j: (0, 0, j)),
                pl.BlockSpec((1, c_block), lambda j: (0, j)),         # summed bias
            ],
            out_specs=pl.BlockSpec((B, c_block), lambda j: (0, j)),
        ),
        compiler_params=pltpu.CompilerParams(
            dimension_semantics=("parallel",),   # class tiles are independent
            vmem_limit_bytes=vmem_limit,
        ),
    )(x, weights, b_sum)


if __name__ == "__main__":
    # Small shapes consistent with the module's forward (Linear: hidden -> classes).
    batch = 8
    hidden_size = 32
    num_classes = 256
    num_models = 4

    key = jax.random.PRNGKey(0)
    kx, kw, kb = jax.random.split(key, 3)

    x = jax.random.normal(kx, (batch, hidden_size), dtype=jnp.float32)
    # TODO(synk): in the original module these come from fc_{i}.pt checkpoints;
    # synthesized deterministically here.  Stored pre-transposed: weights[m] = W_m^T.
    weights = 0.02 * jax.random.normal(
        kw, (num_models, hidden_size, num_classes), dtype=jnp.float32)
    biases = 0.02 * jax.random.normal(
        kb, (num_models, num_classes), dtype=jnp.float32)

    # Reference: sum of per-model linear layers (matches the PyTorch forward).
    ref = jnp.zeros((batch, num_classes), dtype=jnp.float32)
    for m in range(num_models):
        ref = ref + (x @ weights[m] + biases[m][None, :])

    # General path: per-model MXU accumulation inside the kernel.
    out = jax.block_until_ready(ensemble_forward(x, weights, biases))
    assert out.shape == (batch, num_classes)
    assert jnp.allclose(out, ref, atol=1e-4, rtol=1e-4)

    # Static-weight inference path: weights pre-summed (in f32) outside the kernel.
    out2 = jax.block_until_ready(
        ensemble_forward(x, weights, biases, presum_weights=True))
    assert jnp.allclose(out2, ref, atol=1e-4, rtol=1e-4)

    print("KERNEL_OK")
</pallas_src>

<mosaic_0001>
module attributes {stable_mosaic.version = 11 : i64} {
  func.func @ensemble_kernel(%arg0: i32, %arg1: memref<8x32xf32, #tpu.memory_space<vmem>>, %arg2: memref<4x32x128xf32, #tpu.memory_space<vmem>>, %arg3: memref<1x128xf32, #tpu.memory_space<vmem>>, %arg4: memref<8x128xf32, #tpu.memory_space<vmem>>) attributes {dimension_semantics = [#tpu.dimension_semantics<parallel>], iteration_bounds = array<i64: 2>, scalar_prefetch = 0 : i64, scratch_operands = 0 : i64, tpu.core_type = #tpu.core_type<tc>, window_params = [{pipeline_mode = #tpu.pipeline_mode<synchronous>, transform_indices = @transform_0, window_bounds = array<i64: 8, 32>}, {transform_indices = @transform_1, window_bounds = array<i64: 4, 32, 128>}, {transform_indices = @transform_2, window_bounds = array<i64: 1, 128>}, {transform_indices = @transform_3, window_bounds = array<i64: 8, 128>}]} {
    %c0 = arith.constant 0 : index
    %c0_0 = arith.constant 0 : index
    %0 = vector.load %arg1[%c0, %c0_0] : memref<8x32xf32, #tpu.memory_space<vmem>>, vector<8x32xf32>
    %c0_1 = arith.constant 0 : index
    %c0_2 = arith.constant 0 : index
    %1 = vector.load %arg3[%c0_1, %c0_2] : memref<1x128xf32, #tpu.memory_space<vmem>>, vector<1x128xf32>
    %2 = vector.shape_cast %1 : vector<1x128xf32> to vector<1x128xf32>
    %3 = vector.broadcast %2 : vector<1x128xf32> to vector<8x128xf32>
    %c0_3 = arith.constant 0 : index
    %c0_4 = arith.constant 0 : index
    %c0_5 = arith.constant 0 : index
    %4 = vector.load %arg2[%c0_3, %c0_4, %c0_5] : memref<4x32x128xf32, #tpu.memory_space<vmem>>, vector<1x32x128xf32>
    %5 = vector.shape_cast %4 : vector<1x32x128xf32> to vector<32x128xf32>
    %cst = arith.constant dense<0.000000e+00> : vector<8x128xf32>
    %6 = tpu.matmul %0, %5, %cst {dimension_numbers = #tpu.dot_dimension_numbers<[1], [0], [0], [1], [0, 0, 1, 1], [], []>} : vector<8x32xf32>, vector<32x128xf32>, vector<8x128xf32> -> vector<8x128xf32>
    %7 = arith.addf %3, %6 : vector<8x128xf32>
    %c1 = arith.constant 1 : index
    %c0_6 = arith.constant 0 : index
    %c0_7 = arith.constant 0 : index
    %8 = vector.load %arg2[%c1, %c0_6, %c0_7] : memref<4x32x128xf32, #tpu.memory_space<vmem>>, vector<1x32x128xf32>
    %9 = vector.shape_cast %8 : vector<1x32x128xf32> to vector<32x128xf32>
    %cst_8 = arith.constant dense<0.000000e+00> : vector<8x128xf32>
    %10 = tpu.matmul %0, %9, %cst_8 {dimension_numbers = #tpu.dot_dimension_numbers<[1], [0], [0], [1], [0, 0, 1, 1], [], []>} : vector<8x32xf32>, vector<32x128xf32>, vector<8x128xf32> -> vector<8x128xf32>
    %11 = arith.addf %7, %10 : vector<8x128xf32>
    %c2 = arith.constant 2 : index
    %c0_9 = arith.constant 0 : index
    %c0_10 = arith.constant 0 : index
    %12 = vector.load %arg2[%c2, %c0_9, %c0_10] : memref<4x32x128xf32, #tpu.memory_space<vmem>>, vector<1x32x128xf32>
    %13 = vector.shape_cast %12 : vector<1x32x128xf32> to vector<32x128xf32>
    %cst_11 = arith.constant dense<0.000000e+00> : vector<8x128xf32>
    %14 = tpu.matmul %0, %13, %cst_11 {dimension_numbers = #tpu.dot_dimension_numbers<[1], [0], [0], [1], [0, 0, 1, 1], [], []>} : vector<8x32xf32>, vector<32x128xf32>, vector<8x128xf32> -> vector<8x128xf32>
    %15 = arith.addf %11, %14 : vector<8x128xf32>
    %c3 = arith.constant 3 : index
    %c0_12 = arith.constant 0 : index
    %c0_13 = arith.constant 0 : index
    %16 = vector.load %arg2[%c3, %c0_12, %c0_13] : memref<4x32x128xf32, #tpu.memory_space<vmem>>, vector<1x32x128xf32>
    %17 = vector.shape_cast %16 : vector<1x32x128xf32> to vector<32x128xf32>
    %cst_14 = arith.constant dense<0.000000e+00> : vector<8x128xf32>
    %18 = tpu.matmul %0, %17, %cst_14 {dimension_numbers = #tpu.dot_dimension_numbers<[1], [0], [0], [1], [0, 0, 1, 1], [], []>} : vector<8x32xf32>, vector<32x128xf32>, vector<8x128xf32> -> vector<8x128xf32>
    %19 = arith.addf %15, %18 : vector<8x128xf32>
    %c0_15 = arith.constant 0 : index
    %c0_16 = arith.constant 0 : index
    %20 = vector.load %arg4[%c0_15, %c0_16] : memref<8x128xf32, #tpu.memory_space<vmem>>, vector<8x128xf32>
    tpu.vector_store %arg4[%c0_15, %c0_16], %19 {strides = array<i32>} : memref<8x128xf32, #tpu.memory_space<vmem>>, vector<8x128xf32>,
    return
  }
  func.func @transform_0(%arg0: i32) -> (i32, i32) {
    %c0_i32 = arith.constant 0 : i32
    %c0_i32_0 = arith.constant 0 : i32
    %c0_i32_1 = arith.constant 0 : i32
    return %c0_i32, %c0_i32_0 : i32, i32
  }
  func.func @transform_1(%arg0: i32) -> (i32, i32, i32) {
    %c0_i32 = arith.constant 0 : i32
    %c0_i32_0 = arith.constant 0 : i32
    %c0_i32_1 = arith.constant 0 : i32
    return %c0_i32, %c0_i32_0, %arg0 : i32, i32, i32
  }
  func.func @transform_2(%arg0: i32) -> (i32, i32) {
    %c0_i32 = arith.constant 0 : i32
    %c0_i32_0 = arith.constant 0 : i32
    return %c0_i32, %arg0 : i32, i32
  }
  func.func @transform_3(%arg0: i32) -> (i32, i32) {
    %c0_i32 = arith.constant 0 : i32
    %c0_i32_0 = arith.constant 0 : i32
    return %c0_i32, %arg0 : i32, i32
  }
}

</mosaic_0001>

<bundles_post_ra>
// kernel: tpu_custom_call.1
= control target key start
LH: loop header
LB: loop body
LE: loop exit
PB: predicated region body
PF: predicated region fallthrough
CT: control target
= control target key end

     0   :  { %8 = vsyncpa [#allocation3], 0  ;;  %s1211_s0 = inlined_call_operand.hbm [shape: f32[8,32], index: 0, kind: input, shape index: {}]   ;;  %s1212_s1 = inlined_call_operand.hbm [shape: f32[4,32,256], index: 1, kind: input, shape index: {}]   ;;  %s1213_s2 = inlined_call_operand.vmem [shape: f32[1,256], index: 2, kind: input, shape index: {}]   ;;  %s1214_s3 = inlined_call_operand.hbm [shape: f32[8,256], index: 3, kind: output, shape index: {}]  }
   0x1   :  { %9 = vsyncpa [#allocation6], 0 }
   0x2   :  { %11 = vsyncpa [#allocation6 + $0x1], 0 }
   0x3   :  { %12 = vsyncpa [#allocation4], 0 }
   0x4   :  { %14 = vsyncpa [#allocation4 + $0x1], 0  ;;  %s983_s12 = smov 0   ;;  %s985_s13 = smov 0  }
   0x5   :  { %s987_s14 = smov 0   ;;  %s989_s15 = smov 0  }
   0x6 LB: > { %s1004_s16 = sadd.s32 4294967295, %s952_s15   ;;  %s636_s17 = sadd.s32 4294967294, %s952_s15   ;;  %s952_s15 = sphi %s989_s15, %s1239_s15   ;;  %s948_s14 = sphi %s987_s14, %s1238_s14   ;;  %s944_s13 = sphi %s985_s13, %s1237_s13   ;;  %s940_s12 = sphi %s983_s12, %s1236_s12  }
   0x7   : > { %s1008_s18 = sadd.s32 1, %s952_s15   ;;  %s48_s19 = sadd.s32 1, %s948_s14 }
   0x8   : > { %s45_s20 = ssub.s32 %s952_s15, %s1008_s18  ;;  %p55_p0 = scmp.ne.s32.totalorder %s948_s14, %s944_s13 }
   0x9   : > { %p46_p1 = scmp.eq.s32.totalorder %s45_s20, 0  ;;  %p56_p2 = scmp.eq.s32.totalorder %s952_s15, 0 }
   0xa   : > { %p61_p3 = scmp.ne.s32.totalorder %s944_s13, %s940_s12  ;;  %p1215_p4 = scmp.eq.s32.totalorder %s1004_s16, 0 }
   0xb   : > { %s1020_s21 = scalar_select %p46_p1, %s948_s14, %s48_s19  }
   0xc   : > { %p1022_p5 = por %p56_p2, %p55_p0  ;;  %p1028_p6 = por %p1215_p4, %p61_p3 }
   0xd   : > { %p111_p7 = scmp.eq.s32.totalorder %s1004_s16, 1  ;;  %p117_p8 = scmp.eq.s32.totalorder %s636_s17, 1 }
   0xe   : > { %s1221_s23 = scalar_select %p1028_p6, 1, 0 }
   0xf   : > { %p637_p9 = scmp.ge.s32.totalorder %s952_s15, 1  ;;  %p124_p10 = scmp.lt.s32.totalorder %s952_s15, 3 }
  0x10   : > { %p1035_p11 = por %p111_p7, %p55_p0  ;;  %p1039_p12 = por %p117_p8, %p61_p3 }
  0x11   : > { %p1043_p13 = pnand %p637_p9, %p124_p10  ;;  %s954_s27 = smov [#allocation2]  }
  0x12   : > { %s1222_s24 = scalar_select %p1035_p11, 1, 0 }
  0x13   : > { %s1223_s25 = scalar_select %p1039_p12, 1, 0 }
  0x14   : > { %s1224_s26 = scalar_select %p1043_p13, 1, 0 }
  0x15   : > { %p769_p2 = pneg %p1043_p13  ;;  %s137_s28 = sshll.u32 %s954_s27, 4  ;;  %s138_s28 = int_to_ptr.vmem [resolvable:$true] %s137_s28 }
  0x16   : > { %p782_p4 = scmp.lt.s32.totalorder %s952_s15, 2  ;;  %p1225_p0 = scmp.eq.s32.totalorder %s1004_s16, 0 }
  0x17   : > { %s148_s30 = sand.u32 1, %s948_s14   ;;  %s824_s8 = scalar_lea.hbm %s1211_s0, 128 }
  0x18   : > { %p1053_p7 = pnand %p769_p2, %p1225_p0  ;;  %p1060_p3 = pnand %p782_p4, %p1022_p5 }
  0x19   : > { %s640_s5 = sshll.u32 %s148_s30, 7  ;;  %p825_p8 = scmp.ne.s32.totalorder %s1211_s0, %s824_s8 }
  0x1a   : > { %s1227_s4 = scalar_select %p1060_p3, 1, 0 }
  0x1b   : > { %p826_p9 = pneg %p1053_p7  ;;  %p831_p4 = scmp.lt.u32.totalorder %s824_s8, %s1211_s0 }
  0x1d   : > { %p827_p10 = pnand %p826_p9, %p825_p8 }
  0x1f   : > { %p828_p2 = pneg %p827_p10 }
  0x21   : > { %p833_p5 = pnand %p831_p4, %p828_p2 }
  0x23   : > { %836 = shalt.err (!%p833_p5)
}
  0x24   : > { %s837_s19 = scalar_lea.vmem %s138_s28, 128  ;;  %p845_p11 = scmp.lt.s32.totalorder %s138_s28, %s138_s28 }
  0x25   : > { %p838_p0 = scmp.ne.s32.totalorder %s138_s28, %s837_s19  ;;  %p846_p6 = scmp.lt.s32.totalorder %s837_s19, %s837_s19 }
  0x27   : > { %p840_p1 = pnand %p838_p0, %p826_p9  ;;  %p847_p13 = por %p846_p6, %p845_p11 }
  0x29   : > { %p841_p12 = pneg %p840_p1 }
  0x2b   : > { %p848_p3 = pnand %p847_p13, %p841_p12 }
  0x2d   : > { %851 = shalt.err (!%p848_p3)
}
  0x2e   : > { %772 = dma.hbm_to_vmem [thread:$0]  (!%p1053_p7), %s1211_s0, 128, %s138_s28, [#allocation3]  }
  0x2f   : > { %s641_s27 = sshll.u32 %s952_s15, 7  ;;  %s152_s6 = scalar_lea.vmem [#allocation5], %s640_s5 }
  0x30   : > { %s158_s7 = sshll.u32 %s152_s6, 4  ;;  %s1084_s10 = scalar_lea.hbm %s1212_s1, %s641_s27  ;;  %s1086_s7 = int_to_ptr.vmem [resolvable:$true] %s158_s7 }
  0x31   : > { %s1088_s29 = scalar_lea.sflag [#allocation6], %s148_s30  ;;  %s852_s11 = scalar_lea.hbm %s1084_s10, 2048 }
  0x32   : > { %p853_p6 = scmp.ne.s32.totalorder %s1084_s10, %s852_s11  ;;  %p1228_p11 = scmp.ne.s32.totalorder %s1227_s4, 0 }
  0x33   : > { %s857_s17 = scalar_lea.hbm %s1212_s1, 4096  ;;  %p858_p7 = scmp.lt.u32.totalorder %s1084_s10, %s1212_s1 }
  0x34   : > { %p854_p12 = pneg %p1228_p11  ;;  %p859_p3 = scmp.lt.u32.totalorder %s857_s17, %s852_s11 }
  0x35   : > { %p861_p9 = scmp.lt.u32.totalorder %s852_s11, %s1084_s10 }
  0x36   : > { %p855_p13 = pnand %p854_p12, %p853_p6  ;;  %p860_p8 = por %p859_p3, %p858_p7 }
  0x38   : > { %p856_p1 = pneg %p855_p13  ;;  %p862_p10 = por %p861_p9, %p860_p8 }
  0x3a   : > { %p863_p2 = pnand %p862_p10, %p856_p1 }
  0x3c   : > { %866 = shalt.err (!%p863_p2)
}
  0x3d   : > { %s867_s30 = scalar_lea.vmem %s1086_s7, 2048  ;;  %s955_s22 = smov [#allocation5]  }
  0x3e   : > { %p868_p4 = scmp.ne.s32.totalorder %s1086_s7, %s867_s30  ;;  %s872_s27 = sshll.u32 %s955_s22, 4  ;;  %s873_s27 = int_to_ptr.vmem [resolvable:$false] %s872_s27 }
  0x3f   : > { %s874_s6 = scalar_lea.vmem %s873_s27, 4096  ;;  %p875_p6 = scmp.lt.s32.totalorder %s1086_s7, %s873_s27 }
  0x40   : > { %p870_p5 = pnand %p868_p4, %p854_p12  ;;  %p876_p13 = scmp.lt.s32.totalorder %s874_s6, %s867_s30 }
  0x42   : > { %p871_p0 = pneg %p870_p5  ;;  %p877_p7 = por %p876_p13, %p875_p6 }
  0x44   : > { %p878_p3 = pnand %p877_p7, %p871_p0 }
  0x46   : > { %881 = shalt.err (!%p878_p3)
}
  0x47   : > { %s956_s8 = smov 256   ;;  %s957_s9 = smov 128  }
  0x48   : > { %s958_s11 = smov 8   ;;  %p1229_p12 = scmp.ne.s32.totalorder %s1224_s26, 0 }
  0x49   : > { %776 = dma.hbm_to_vmem [thread:$0]  (!%p1228_p11), %s1084_s10, 2048, %s1086_s7, %s1088_s29, %s956_s8, %s957_s9, %s958_s11  }
  0x4a   : > { %176 = sbr.rel (%p1229_p12) target bundleno = 334 (0x14e), region = 32  ;;  %p1230_p1 = scmp.eq.s32.totalorder (!%p1229_p12), %s1004_s16, 0 }
  0x51   : > { %927 = dma.done.wait (%p1230_p1), [#allocation3], 128   ;;  %p1231_p8 = pmov %p1230_p1 }
  0x52   : > { %s1123_s28 = sand.u32 1, %s944_s13   ;;  %p1232_p11 = scmp.ne.s32.totalorder %s1221_s23, 0 }
  0x53   : > { %929 = vsyncadd (%p1231_p8), [#allocation3], 4294967168  ;;  %s644_s5 = sshll.u32 %s1123_s28, 7  ;;  %s183_s17 = scalar_lea.sflag [#allocation6], %s1123_s28 }
  0x54   : > { %s1127_s19 = scalar_lea.vmem [#allocation5], %s644_s5 }
  0x55   : > { %931 = dma.done.wait (%p1232_p11), %s183_s17, 2048  }
  0x56   : > { %933 = vsyncadd (%p1232_p11), %s183_s17, 4294965248  ;;  %v959_v0 = vmov 0.0|0.0   ;;  %vm960_vm0 = vmmov 0   ;;  %v961_v1 = vmov 0.0   ;;  %v223_v2 = vld [vmem:[%s1127_s19] sm:$0xff]  ;;  %v224_v3 = vld [vmem:[%s1127_s19 + $0x8] sm:$0xff] }
  0x57   : > { %731 = vmatprep.subr.bf16.mxu1 %v959_v0  ;;  %743 = vmatprep.subr.bf16.mxu0 %v959_v0  ;;  %v653_v4 = vld [vmem:[%s1127_s19 + $0x40] sm:$0xff]  ;;  %v732_v5 = vpack.c.bf16 %v224_v3, %v223_v2  ;;  %v654_v6 = vld [vmem:[%s1127_s19 + $0x48] sm:$0xff]  ;;  %v225_v7 = vld [vmem:[%s1127_s19 + $0x10] sm:$0xff]  ;;  %vm227_vm1 = vcmask 261120   ;;  %p212_p9 = scmp.lt.s32.totalorder %s1004_s16, 1  ;;  %s645_s26 = sshll.u32 %s1123_s28, 3 }
  0x58   : > { %695 = vmatprep.mubr.msk.f32.mxu1 %vm960_vm0, %v961_v1  ;;  %717 = vmatprep.mubr.msk.f32.mxu0 %vm960_vm0, %v961_v1  ;;  %v226_v8 = vld [vmem:[%s1127_s19 + $0x18] sm:$0xff]  ;;  %v744_v9 = vpack.c.bf16 %v654_v6, %v653_v4  ;;  %v655_v10 = vld [vmem:[%s1127_s19 + $0x50] sm:$0xff]  ;;  %v648_v14 = vld [vmem:[%s1127_s19 + $0x20] sm:$0xff]  ;;  %s664_s29 = sshll.u32 %s1004_s16, 7  ;;  %s211_s20 = scalar_lea.vmem [#allocation7], %s645_s26 }
  0x59   : > { %v656_v11 = vld [vmem:[%s1127_s19 + $0x58] sm:$0xff]  ;;  %733 = vmatpush3.bf16.msra.mxu1 %v732_v5  ;;  %v735_v12 = vpack.c.bf16 %v226_v8, %v225_v7  ;;  %v649_v15 = vld [vmem:[%s1127_s19 + $0x28] sm:$0xff]  ;;  %v658_v16 = vld [vmem:[%s1127_s19 + $0x60] sm:$0xff]  ;;  %s213_s23 = scalar_select %p212_p9, %s1004_s16, 1 }
  0x5a   : > { %745 = vmatpush3.bf16.msra.mxu0 %v744_v9  ;;  %734 = vmatprep.subr.bf16.mxu1 %v959_v0  ;;  %v747_v13 = vpack.c.bf16 %v656_v11, %v655_v10  ;;  %v659_v17 = vld [vmem:[%s1127_s19 + $0x68] sm:$0xff]  ;;  %v215_v18 = vld [vmem:[#allocation2] sm:$0xff]  ;;  %v738_v19 = vpack.c.bf16 %v649_v15, %v648_v14  ;;  %v650_v21 = vld [vmem:[%s1127_s19 + $0x30] sm:$0xff]  ;;  %s545_s30 = sshll.u32 %s211_s20, 4  ;;  %s1167_s6 = scalar_lea.hbm %s1214_s3, %s664_s29  ;;  %s1169_s30 = int_to_ptr.vmem [resolvable:$true] %s545_s30 }
  0x5b   : > { %746 = vmatprep.subr.bf16.mxu0 %v959_v0  ;;  %v750_v20 = vpack.c.bf16 %v659_v17, %v658_v16  ;;  %v651_v22 = vld [vmem:[%s1127_s19 + $0x38] sm:$0xff]  ;;  %v660_v23 = vld [vmem:[%s1127_s19 + $0x70] sm:$0xff]  ;;  %s214_s10 = scalar_lea.vmem %s1213_s2, %s213_s23  ;;  %s532_s8 = scalar_lea.sflag [#allocation4], %s1123_s28 }
  0x5c   : > { %v661_v24 = vld [vmem:[%s1127_s19 + $0x78] sm:$0xff]  ;;  %v741_v25 = vpack.c.bf16 %v651_v22, %v650_v21  ;;  %s882_s16 = scalar_lea.vmem %s1169_s30, 128  ;;  %p1233_p2 = scmp.ne.s32.totalorder %s1222_s24, 0 }
  0x5d   : > { %736 = vmatpush3.bf16.msra.mxu1 %v735_v12  ;;  %v753_v26 = vpack.c.bf16 %v661_v24, %v660_v23  ;;  %v646_v27 = vld [vmem:[%s214_s10] ss:$0 sm:$0xff]  ;;  %p883_p10 = scmp.ne.s32.totalorder %s1169_s30, %s882_s16  ;;  %s962_s9 = smov [#allocation7]  }
  0x5e   : > { %748 = vmatpush3.bf16.msra.mxu0 %v747_v13  ;;  %737 = vmatprep.subr.bf16.mxu1 %v959_v0  ;;  %s886_s11 = sshll.u32 %s962_s9, 4  ;;  %s887_s11 = int_to_ptr.vmem [resolvable:$false] %s886_s11 }
  0x5f   : > { %749 = vmatprep.subr.bf16.mxu0 %v959_v0  ;;  %p884_p4 = pnand %p883_p10, %p1233_p2  ;;  %s888_s5 = scalar_lea.vmem %s887_s11, 256 }
  0x60   : > { %696 = vmatmul.mubr.msk.f32.vlgmr.msra.gmra.mrb[0].mxu1 %vm227_vm1, %v215_v18  ;;  %p889_p0 = scmp.lt.s32.totalorder %s1169_s30, %s887_s11  ;;  %p890_p6 = scmp.lt.s32.totalorder %s888_s5, %s882_s16 }
  0x61   : > { %718 = vmatmul.mubr.msk.f32.vlgmr.msra.gmra.mrb[0].mxu0 %vm227_vm1, %v215_v18  ;;  %739 = vmatpush3.bf16.msra.mxu1 %v738_v19  ;;  %p885_p5 = pneg %p884_p4 }
  0x62   : > { %751 = vmatpush3.bf16.msra.mxu0 %v750_v20  ;;  %740 = vmatprep.subr.bf16.mxu1 %v959_v0  ;;  %p891_p13 = por %p890_p6, %p889_p0 }
  0x63   : > { %752 = vmatprep.subr.bf16.mxu0 %v959_v0  ;;  %706 = vmatprep.mubr.msk.f32.mxu1 %vm960_vm0, %v961_v1 }
  0x64   : > { %728 = vmatprep.mubr.msk.f32.mxu0 %vm960_vm0, %v961_v1  ;;  %p892_p7 = pnand %p891_p13, %p885_p5 }
  0x65   : > { %742 = vmatpush3.bf16.msra.mxu1 %v741_v25 }
  0x66   : > { %754 = vmatpush3.bf16.msra.mxu0 %v753_v26 }
  0x68   : > { %707 = vmatmul.mubr.msk.f32.vlgmr.msra.gmra.mrb[0].mxu1 %vm227_vm1, %v215_v18 }
  0x69   : > { %729 = vmatmul.mubr.msk.f32.vlgmr.msra.gmra.mrb[0].mxu0 %vm227_vm1, %v215_v18 }
 0x13b   : > { %v373_v28 = vpop.f32.mrb[0].mxu1 }
 0x13c   : > { %v755_v29 = vadd.f32 %v646_v27, %v373_v28  ;;  %v525_v30 = vpop.f32.mrb[0].mxu0  ;;  %v708_v31 = vpop.f32.mrb[1].mxu1 }
 0x13d   : > { %v730_v32 = vpop.f32.mrb[1].mxu0 }
 0x13e   : > { %v756_v33 = vadd.f32 %v755_v29, %v525_v30 }
 0x140   : > { %530 = vst [vmem:[%s211_s20] sm:$0xff] %v756_v33 }
 0x141   : > { %895 = shalt.err (!%p892_p7)
}
 0x142   : > { %s896_s28 = scalar_lea.hbm %s1167_s6, 128  ;;  %s900_s23 = scalar_lea.hbm %s1214_s3, 256 }
 0x143   : > { %p897_p3 = scmp.ne.s32.totalorder %s1167_s6, %s896_s28  ;;  %p901_p8 = scmp.lt.u32.totalorder %s1167_s6, %s1214_s3 }
 0x144   : > { %p902_p11 = scmp.lt.u32.totalorder %s900_s23, %s896_s28  ;;  %p904_p10 = scmp.lt.u32.totalorder %s896_s28, %s1167_s6 }
 0x145   : > { %p898_p12 = pnand %p897_p3, %p1233_p2 }
 0x146   : > { %p903_p9 = por %p902_p11, %p901_p8 }
 0x147   : > { %p899_p1 = pneg %p898_p12 }
 0x148   : > { %p905_p4 = por %p904_p10, %p903_p9 }
 0x14a   : > { %p906_p5 = pnand %p905_p4, %p899_p1 }
 0x14c   : > { %909 = shalt.err (!%p906_p5)
}
 0x14d   : > { %767 = dma.vmem_to_hbm [thread:$0]  (%p1233_p2), %s1169_s30, 128, %s1167_s6, %s532_s8  }
 0x14e PF: > { %s557_s7 = sand.u32 1, %s940_s12   ;;  %p1234_p0 = scmp.ne.s32.totalorder %s1223_s25, 0 }
 0x14f   : > { %p1235_p6 = scmp.ge.s32.totalorder %s952_s15, 2  ;;  %s558_s10 = scalar_lea.sflag [#allocation4], %s557_s7 }
 0x151   : > { %p778_p13 = pnand %p1235_p6, %p1234_p0 }
 0x153   : > { %935 = dma.done.wait (!%p778_p13), %s558_s10, 128  }
 0x154   : > { %937 = vsyncadd (!%p778_p13), %s558_s10, 4294967168  ;;  %p17_p7 = scmp.ge.s32.totalorder %s1008_s18, 4   ;;  %s1236_s12 = smov %s944_s13 }
 0x155   : > { %s1237_s13 = smov %s948_s14  ;;  %s1238_s14 = smov %s1020_s21 }
 0x156   : > { %s1239_s15 = smov %s1008_s18  ;;  %19 = sbr.rel (!%p17_p7) target bundleno = 6 (0x6), region = 88 }
 0x15d   :  { %563 = vsyncpa [#allocation3], 1 }
 0x15e   :  { %565 = vsyncpa [#allocation3 + $0x1], 1 }
 0x15f   :  { %566 = vsyncpa [#allocation6], 1 }
 0x160   :  { %568 = vsyncpa [#allocation6 + $0x1], 1 }
 0x161   :  { %569 = vsyncpa [#allocation4], 1 }
 0x162   :  { %571 = vsyncpa [#allocation4 + $0x1], 1 }

</bundles_post_ra>
